<compile_context>
chip_gen: v6e
topology: v6e:2x2x1
jax: 0.10.0
libtpu: 0.0.40
codegen_flags: <defaults>
</compile_context>

<pallas_src>
import functools

import jax
import jax.numpy as jnp
import numpy as np
from jax.experimental import pallas as pl
from jax.experimental.pallas import tpu as pltpu

SEQ = 7      # Encoder.forward reshapes its input to (-1, 1, 7)
OUT1 = 7     # Fea_encoder output width
OUT2 = 11    # Output_encoder output width
SLAB = 128   # lane-dense combined output slab (out1 -> lanes [0,7), out2 -> [7,18))

_ARG_ORDER = (
    "f_c1_even", "f_c1_odd", "f_b1", "f_c2_p0", "f_c2_p1", "f_b2",
    "f_l1", "f_lb1", "f_l2", "f_lb2",
    "o_c1_even", "o_c1_odd", "o_b1", "o_c2_p0", "o_c2_p1", "o_b2",
    "o_l1", "o_lb1", "o_l2", "o_lb2",
)


# ----------------------------------------------------------------------------
# Host-side weight folding: Conv1d('same') -> Toeplitz matmul slabs
# ----------------------------------------------------------------------------
def _toeplitz(w, pad_left, in_len, out_positions):
    """Fold a Conv1d('same') into one matmul weight.

    Input slab columns are position-major / channel-minor (col = p*Cin + ic);
    output columns are (pool_slot, out_channel) (col = oi*Cout + c).
    Padding zeros are baked into the weight (zero rows/cols), so the kernel
    never pads or slices along the lane axis.
    """
    w = np.asarray(w, np.float32)
    Cout, Cin, K = w.shape
    W = np.zeros((in_len * Cin, len(out_positions) * Cout), np.float32)
    for oi, t in enumerate(out_positions):
        for p in range(in_len):
            k = p + pad_left - t
            if 0 <= k < K:
                W[p * Cin:(p + 1) * Cin, oi * Cout:(oi + 1) * Cout] = w[:, :, k].T
    return W


def pack_params(p, compute_dtype=jnp.bfloat16):
    """Build matmul-ready weight slabs (done once, on the host)."""
    def mm(w):       # matmul operands -> bf16 (MXU native), biases stay f32
        return jnp.asarray(np.asarray(w, np.float32), compute_dtype)

    def bias(b):
        return jnp.asarray(np.asarray(b, np.float32).reshape(1, -1))

    packed = {}

    # ---- Fea_encoder: kernel 4, PyTorch 'same' pads (left=1, right=2) ------
    packed["f_c1_even"] = mm(_toeplitz(p["fw1"], 1, SEQ, (0, 2, 4)))   # (7, 24)
    packed["f_c1_odd"] = mm(_toeplitz(p["fw1"], 1, SEQ, (1, 3, 5)))    # (7, 24)
    packed["f_b1"] = bias(np.tile(np.asarray(p["fb1"]), 3))            # (1, 24)
    packed["f_c2_p0"] = mm(_toeplitz(p["fw2"], 1, 3, (0,)))            # (24, 32)
    packed["f_c2_p1"] = mm(_toeplitz(p["fw2"], 1, 3, (1,)))            # (24, 32)
    packed["f_b2"] = bias(p["fb2"])                                    # (1, 32)
    packed["f_l1"] = mm(np.asarray(p["ff1w"]).T)                       # (32, 64)
    packed["f_lb1"] = bias(p["ff1b"])                                  # (1, 64)
    w2 = np.zeros((64, SLAB), np.float32)
    w2[:, :OUT1] = np.asarray(p["ff2w"]).T
    b2 = np.zeros((SLAB,), np.float32)
    b2[:OUT1] = np.asarray(p["ff2b"])
    packed["f_l2"] = mm(w2)                                            # (64, 128)
    packed["f_lb2"] = bias(b2)                                         # (1, 128)

    # ---- Output_encoder: kernel 3, 'same' pads (1, 1).  Its input is the ---
    # 128-lane out1 slab (real data in lanes 0..6), so Toeplitz rows are
    # zero-padded from 7 to 128.
    c1e = np.zeros((SLAB, 24), np.float32)
    c1e[:SEQ] = _toeplitz(p["ow1"], 1, SEQ, (0, 2, 4))
    c1o = np.zeros((SLAB, 24), np.float32)
    c1o[:SEQ] = _toeplitz(p["ow1"], 1, SEQ, (1, 3, 5))
    packed["o_c1_even"] = mm(c1e)                                      # (128, 24)
    packed["o_c1_odd"] = mm(c1o)                                       # (128, 24)
    packed["o_b1"] = bias(np.tile(np.asarray(p["ob1"]), 3))            # (1, 24)
    packed["o_c2_p0"] = mm(_toeplitz(p["ow2"], 1, 3, (0,)))            # (24, 32)
    packed["o_c2_p1"] = mm(_toeplitz(p["ow2"], 1, 3, (1,)))            # (24, 32)
    packed["o_b2"] = bias(p["ob2"])                                    # (1, 32)
    packed["o_l1"] = mm(np.asarray(p["of1w"]).T)                       # (32, 16)
    packed["o_lb1"] = bias(p["of1b"])                                  # (1, 16)
    w2 = np.zeros((16, SLAB), np.float32)
    w2[:, OUT1:OUT1 + OUT2] = np.asarray(p["of2w"]).T
    b2 = np.zeros((SLAB,), np.float32)
    b2[OUT1:OUT1 + OUT2] = np.asarray(p["of2b"])
    packed["o_l2"] = mm(w2)                                            # (16, 128)
    packed["o_lb2"] = bias(b2)                                         # (1, 128)
    return packed


# ----------------------------------------------------------------------------
# Forward math (shared by the Pallas kernel and the pure-JAX mirror reference)
# ----------------------------------------------------------------------------
def _forward_slab(x, w):
    """x: (B, 7) f32  ->  (B, 128) f32 slab: out1 in lanes [0,7), out2 in [7,18)."""
    def dot(a, b):  # bf16 MXU matmul, f32 accumulation
        return jnp.dot(a.astype(b.dtype), b, preferred_element_type=jnp.float32)

    # Fea_encoder: conv1+ReLU+pool / conv2+ReLU+pool / Linear+ReLU / Linear
    h = jnp.maximum(jnp.maximum(dot(x, w["f_c1_even"]), dot(x, w["f_c1_odd"]))
                    + w["f_b1"], 0.0)                                   # (B, 24)
    h = jnp.maximum(jnp.maximum(dot(h, w["f_c2_p0"]), dot(h, w["f_c2_p1"]))
                    + w["f_b2"], 0.0)                                   # (B, 32)
    h = jnp.maximum(dot(h, w["f_l1"]) + w["f_lb1"], 0.0)                # (B, 64)
    out1 = dot(h, w["f_l2"]) + w["f_lb2"]                               # (B, 128): lanes 0..6 real

    # Output_encoder on out1 (zero-padded Toeplitz rows absorb the pad lanes)
    h = jnp.maximum(jnp.maximum(dot(out1, w["o_c1_even"]), dot(out1, w["o_c1_odd"]))
                    + w["o_b1"], 0.0)                                   # (B, 24)
    h = jnp.maximum(jnp.maximum(dot(h, w["o_c2_p0"]), dot(h, w["o_c2_p1"]))
                    + w["o_b2"], 0.0)                                   # (B, 32)
    h = jnp.maximum(dot(h, w["o_l1"]) + w["o_lb1"], 0.0)                # (B, 16)
    out2 = dot(h, w["o_l2"]) + w["o_lb2"]                               # (B, 128): lanes 7..17 real

    return out1 + out2  # disjoint lane ranges -> combined lane-dense slab


def encoder_kernel(x_ref, *refs):
    *w_refs, out_ref = refs
    w = {name: r[...] for name, r in zip(_ARG_ORDER, w_refs)}
    out_ref[...] = _forward_slab(x_ref[...], w)


# ----------------------------------------------------------------------------
# Wrapper
# ----------------------------------------------------------------------------
def _round_up(n, m):
    return ((n + m - 1) // m) * m


def encoder_forward(x, packed, *, block_b=512):
    """Returns (output1: (B, 7), output_attri: (B, 11)), matching Encoder.forward."""
    x = jnp.asarray(x, jnp.float32).reshape(-1, SEQ)   # mirrors input.reshape(-1, 1, 7)
    B = x.shape[0]

    tb = min(block_b, _round_up(B, 8))                 # batch tile (sublane-aligned)
    Bp = _round_up(B, tb)
    if Bp != B:
        x = jnp.pad(x, ((0, Bp - B), (0, 0)))

    weights = [packed[k] for k in _ARG_ORDER]
    w_specs = [pl.BlockSpec(w.shape, lambda i: (0, 0)) for w in weights]  # stay resident

    flops_per_row = 2 * (2 * 7 * 24 + 2 * 24 * 32 + 32 * 64 + 64 * 128
                         + 2 * 128 * 24 + 2 * 24 * 32 + 32 * 16 + 16 * 128)
    cost = pl.CostEstimate(
        flops=Bp * flops_per_row,
        transcendentals=0,
        bytes_accessed=Bp * (SEQ + SLAB) * 4
        + sum(int(w.size) * w.dtype.itemsize for w in weights),
    )

    slab = pl.pallas_call(
        encoder_kernel,
        out_shape=jax.ShapeDtypeStruct((Bp, SLAB), jnp.float32),
        grid=(Bp // tb,),
        in_specs=[pl.BlockSpec((tb, SEQ), lambda i: (i, 0))] + w_specs,
        out_specs=pl.BlockSpec((tb, SLAB), lambda i: (i, 0)),
        compiler_params=pltpu.CompilerParams(
            dimension_semantics=("parallel",),          # dual-TC sharding on v7x
        ),
        cost_estimate=cost,
    )(x, *weights)

    return slab[:B, :OUT1], slab[:B, OUT1:OUT1 + OUT2]


# ----------------------------------------------------------------------------
# References
# ----------------------------------------------------------------------------
def encoder_reference_packed(x, packed):
    """Pure-JAX mirror of the kernel math (same Toeplitz folding + bf16 operands)."""
    slab = _forward_slab(jnp.asarray(x, jnp.float32).reshape(-1, SEQ), packed)
    return slab[:, :OUT1], slab[:, OUT1:OUT1 + OUT2]


def _branch_ref(x, w1, b1, pad1, w2, b2, pad2, l1w, l1b, l2w, l2b):
    """Direct f32 mirror of Conv1d('same')->ReLU->MaxPool->Conv1d('same')->ReLU
    ->MaxPool->Flatten->Linear->ReLU->Linear for length-7 inputs."""
    K1 = w1.shape[2]
    K2 = w2.shape[2]
    xp = jnp.pad(x[:, None, :], ((0, 0), (0, 0), pad1))
    y1 = jnp.stack([jnp.einsum("bik,oik->bo", xp[:, :, t:t + K1], w1)
                    for t in range(SEQ)], axis=-1) + b1[None, :, None]
    y1 = jnp.maximum(y1, 0.0)                                   # (B, C1, 7)
    p1 = jnp.maximum(y1[:, :, 0:6:2], y1[:, :, 1:6:2])          # (B, C1, 3)
    p1p = jnp.pad(p1, ((0, 0), (0, 0), pad2))
    y2 = jnp.stack([jnp.einsum("bik,oik->bo", p1p[:, :, t:t + K2], w2)
                    for t in range(3)], axis=-1) + b2[None, :, None]
    y2 = jnp.maximum(y2, 0.0)                                   # (B, C2, 3)
    f = jnp.maximum(y2[:, :, 0], y2[:, :, 1])                   # (B, C2)
    h = jnp.maximum(f @ l1w.T + l1b, 0.0)
    return h @ l2w.T + l2b


def encoder_reference(x, p):
    x = jnp.asarray(x, jnp.float32).reshape(-1, SEQ)
    out1 = _branch_ref(x, p["fw1"], p["fb1"], (1, 2), p["fw2"], p["fb2"], (1, 2),
                       p["ff1w"], p["ff1b"], p["ff2w"], p["ff2b"])
    out2 = _branch_ref(out1, p["ow1"], p["ob1"], (1, 1), p["ow2"], p["ob2"], (1, 1),
                       p["of1w"], p["of1b"], p["of2w"], p["of2b"])
    return out1, out2


# ----------------------------------------------------------------------------
# Params
# ----------------------------------------------------------------------------
def init_params(key):
    """Deterministic PyTorch-style uniform(-1/sqrt(fan_in), 1/sqrt(fan_in)) init."""
    def u(k, shape, fan_in):
        bound = 1.0 / np.sqrt(fan_in)
        return jax.random.uniform(k, shape, jnp.float32, -bound, bound)

    ks = jax.random.split(key, 16)
    return {
        # Fea_encoder
        "fw1": u(ks[0], (8, 1, 4), 1 * 4), "fb1": u(ks[1], (8,), 1 * 4),
        "fw2": u(ks[2], (32, 8, 4), 8 * 4), "fb2": u(ks[3], (32,), 8 * 4),
        "ff1w": u(ks[4], (64, 32), 32), "ff1b": u(ks[5], (64,), 32),
        "ff2w": u(ks[6], (7, 64), 64), "ff2b": u(ks[7], (7,), 64),
        # Output_encoder
        "ow1": u(ks[8], (8, 1, 3), 1 * 3), "ob1": u(ks[9], (8,), 1 * 3),
        "ow2": u(ks[10], (32, 8, 3), 8 * 3), "ob2": u(ks[11], (32,), 8 * 3),
        "of1w": u(ks[12], (16, 32), 32), "of1b": u(ks[13], (16,), 32),
        "of2w": u(ks[14], (11, 16), 16), "of2b": u(ks[15], (11,), 16),
    }


if __name__ == "__main__":
    key = jax.random.PRNGKey(0)
    kx, kp = jax.random.split(key)

    B = 8
    x = jax.random.uniform(kx, (B, SEQ), jnp.float32, -1.0, 1.0)
    params = init_params(kp)
    packed = pack_params(params)

    out1, out2 = jax.block_until_ready(encoder_forward(x, packed))
    assert out1.shape == (B, OUT1) and out2.shape == (B, OUT2)

    # 1) Exact-math mirror (same Toeplitz folding + bf16 matmul operands).
    m1, m2 = encoder_reference_packed(x, packed)
    np.testing.assert_allclose(np.asarray(out1), np.asarray(m1), rtol=2e-3, atol=2e-3)
    np.testing.assert_allclose(np.asarray(out2), np.asarray(m2), rtol=2e-3, atol=2e-3)

    # 2) Full-f32 reference of the original PyTorch math (loose: absorbs bf16 rounding).
    r1, r2 = encoder_reference(x, params)
    np.testing.assert_allclose(np.asarray(out1), np.asarray(r1), rtol=5e-2, atol=5e-2)
    np.testing.assert_allclose(np.asarray(out2), np.asarray(r2), rtol=5e-2, atol=5e-2)

    print("KERNEL_OK")
</pallas_src>

<mosaic_0001>
module attributes {stable_mosaic.version = 11 : i64} {
  func.func @encoder_kernel(%arg0: i32, %arg1: memref<8x7xf32, #tpu.memory_space<vmem>>, %arg2: memref<7x24xbf16, #tpu.memory_space<vmem>>, %arg3: memref<7x24xbf16, #tpu.memory_space<vmem>>, %arg4: memref<1x24xf32, #tpu.memory_space<vmem>>, %arg5: memref<24x32xbf16, #tpu.memory_space<vmem>>, %arg6: memref<24x32xbf16, #tpu.memory_space<vmem>>, %arg7: memref<1x32xf32, #tpu.memory_space<vmem>>, %arg8: memref<32x64xbf16, #tpu.memory_space<vmem>>, %arg9: memref<1x64xf32, #tpu.memory_space<vmem>>, %arg10: memref<64x128xbf16, #tpu.memory_space<vmem>>, %arg11: memref<1x128xf32, #tpu.memory_space<vmem>>, %arg12: memref<128x24xbf16, #tpu.memory_space<vmem>>, %arg13: memref<128x24xbf16, #tpu.memory_space<vmem>>, %arg14: memref<1x24xf32, #tpu.memory_space<vmem>>, %arg15: memref<24x32xbf16, #tpu.memory_space<vmem>>, %arg16: memref<24x32xbf16, #tpu.memory_space<vmem>>, %arg17: memref<1x32xf32, #tpu.memory_space<vmem>>, %arg18: memref<32x16xbf16, #tpu.memory_space<vmem>>, %arg19: memref<1x16xf32, #tpu.memory_space<vmem>>, %arg20: memref<16x128xbf16, #tpu.memory_space<vmem>>, %arg21: memref<1x128xf32, #tpu.memory_space<vmem>>, %arg22: memref<8x128xf32, #tpu.memory_space<vmem>>) attributes {dimension_semantics = [#tpu.dimension_semantics<parallel>], iteration_bounds = array<i64: 1>, scalar_prefetch = 0 : i64, scratch_operands = 0 : i64, tpu.core_type = #tpu.core_type<tc>, window_params = [{transform_indices = @transform_0, window_bounds = array<i64: 8, 7>}, {pipeline_mode = #tpu.pipeline_mode<synchronous>, transform_indices = @transform_1, window_bounds = array<i64: 7, 24>}, {pipeline_mode = #tpu.pipeline_mode<synchronous>, transform_indices = @transform_2, window_bounds = array<i64: 7, 24>}, {pipeline_mode = #tpu.pipeline_mode<synchronous>, transform_indices = @transform_3, window_bounds = array<i64: 1, 24>}, {pipeline_mode = #tpu.pipeline_mode<synchronous>, transform_indices = @transform_4, window_bounds = array<i64: 24, 32>}, {pipeline_mode = #tpu.pipeline_mode<synchronous>, transform_indices = @transform_5, window_bounds = array<i64: 24, 32>}, {pipeline_mode = #tpu.pipeline_mode<synchronous>, transform_indices = @transform_6, window_bounds = array<i64: 1, 32>}, {pipeline_mode = #tpu.pipeline_mode<synchronous>, transform_indices = @transform_7, window_bounds = array<i64: 32, 64>}, {pipeline_mode = #tpu.pipeline_mode<synchronous>, transform_indices = @transform_8, window_bounds = array<i64: 1, 64>}, {pipeline_mode = #tpu.pipeline_mode<synchronous>, transform_indices = @transform_9, window_bounds = array<i64: 64, 128>}, {pipeline_mode = #tpu.pipeline_mode<synchronous>, transform_indices = @transform_10, window_bounds = array<i64: 1, 128>}, {pipeline_mode = #tpu.pipeline_mode<synchronous>, transform_indices = @transform_11, window_bounds = array<i64: 128, 24>}, {pipeline_mode = #tpu.pipeline_mode<synchronous>, transform_indices = @transform_12, window_bounds = array<i64: 128, 24>}, {pipeline_mode = #tpu.pipeline_mode<synchronous>, transform_indices = @transform_13, window_bounds = array<i64: 1, 24>}, {pipeline_mode = #tpu.pipeline_mode<synchronous>, transform_indices = @transform_14, window_bounds = array<i64: 24, 32>}, {pipeline_mode = #tpu.pipeline_mode<synchronous>, transform_indices = @transform_15, window_bounds = array<i64: 24, 32>}, {pipeline_mode = #tpu.pipeline_mode<synchronous>, transform_indices = @transform_16, window_bounds = array<i64: 1, 32>}, {pipeline_mode = #tpu.pipeline_mode<synchronous>, transform_indices = @transform_17, window_bounds = array<i64: 32, 16>}, {pipeline_mode = #tpu.pipeline_mode<synchronous>, transform_indices = @transform_18, window_bounds = array<i64: 1, 16>}, {pipeline_mode = #tpu.pipeline_mode<synchronous>, transform_indices = @transform_19, window_bounds = array<i64: 16, 128>}, {pipeline_mode = #tpu.pipeline_mode<synchronous>, transform_indices = @transform_20, window_bounds = array<i64: 1, 128>}, {transform_indices = @transform_21, window_bounds = array<i64: 8, 128>}]} {
    %c0 = arith.constant 0 : index
    %c0_0 = arith.constant 0 : index
    %0 = vector.load %arg2[%c0, %c0_0] : memref<7x24xbf16, #tpu.memory_space<vmem>>, vector<7x24xbf16>
    %c0_1 = arith.constant 0 : index
    %c0_2 = arith.constant 0 : index
    %1 = vector.load %arg3[%c0_1, %c0_2] : memref<7x24xbf16, #tpu.memory_space<vmem>>, vector<7x24xbf16>
    %c0_3 = arith.constant 0 : index
    %c0_4 = arith.constant 0 : index
    %2 = vector.load %arg4[%c0_3, %c0_4] : memref<1x24xf32, #tpu.memory_space<vmem>>, vector<1x24xf32>
    %c0_5 = arith.constant 0 : index
    %c0_6 = arith.constant 0 : index
    %3 = vector.load %arg5[%c0_5, %c0_6] : memref<24x32xbf16, #tpu.memory_space<vmem>>, vector<24x32xbf16>
    %c0_7 = arith.constant 0 : index
    %c0_8 = arith.constant 0 : index
    %4 = vector.load %arg6[%c0_7, %c0_8] : memref<24x32xbf16, #tpu.memory_space<vmem>>, vector<24x32xbf16>
    %c0_9 = arith.constant 0 : index
    %c0_10 = arith.constant 0 : index
    %5 = vector.load %arg7[%c0_9, %c0_10] : memref<1x32xf32, #tpu.memory_space<vmem>>, vector<1x32xf32>
    %c0_11 = arith.constant 0 : index
    %c0_12 = arith.constant 0 : index
    %6 = vector.load %arg8[%c0_11, %c0_12] : memref<32x64xbf16, #tpu.memory_space<vmem>>, vector<32x64xbf16>
    %c0_13 = arith.constant 0 : index
    %c0_14 = arith.constant 0 : index
    %7 = vector.load %arg9[%c0_13, %c0_14] : memref<1x64xf32, #tpu.memory_space<vmem>>, vector<1x64xf32>
    %c0_15 = arith.constant 0 : index
    %c0_16 = arith.constant 0 : index
    %8 = vector.load %arg10[%c0_15, %c0_16] : memref<64x128xbf16, #tpu.memory_space<vmem>>, vector<64x128xbf16>
    %c0_17 = arith.constant 0 : index
    %c0_18 = arith.constant 0 : index
    %9 = vector.load %arg11[%c0_17, %c0_18] : memref<1x128xf32, #tpu.memory_space<vmem>>, vector<1x128xf32>
    %c0_19 = arith.constant 0 : index
    %c0_20 = arith.constant 0 : index
    %10 = vector.load %arg12[%c0_19, %c0_20] : memref<128x24xbf16, #tpu.memory_space<vmem>>, vector<128x24xbf16>
    %c0_21 = arith.constant 0 : index
    %c0_22 = arith.constant 0 : index
    %11 = vector.load %arg13[%c0_21, %c0_22] : memref<128x24xbf16, #tpu.memory_space<vmem>>, vector<128x24xbf16>
    %c0_23 = arith.constant 0 : index
    %c0_24 = arith.constant 0 : index
    %12 = vector.load %arg14[%c0_23, %c0_24] : memref<1x24xf32, #tpu.memory_space<vmem>>, vector<1x24xf32>
    %c0_25 = arith.constant 0 : index
    %c0_26 = arith.constant 0 : index
    %13 = vector.load %arg15[%c0_25, %c0_26] : memref<24x32xbf16, #tpu.memory_space<vmem>>, vector<24x32xbf16>
    %c0_27 = arith.constant 0 : index
    %c0_28 = arith.constant 0 : index
    %14 = vector.load %arg16[%c0_27, %c0_28] : memref<24x32xbf16, #tpu.memory_space<vmem>>, vector<24x32xbf16>
    %c0_29 = arith.constant 0 : index
    %c0_30 = arith.constant 0 : index
    %15 = vector.load %arg17[%c0_29, %c0_30] : memref<1x32xf32, #tpu.memory_space<vmem>>, vector<1x32xf32>
    %c0_31 = arith.constant 0 : index
    %c0_32 = arith.constant 0 : index
    %16 = vector.load %arg18[%c0_31, %c0_32] : memref<32x16xbf16, #tpu.memory_space<vmem>>, vector<32x16xbf16>
    %c0_33 = arith.constant 0 : index
    %c0_34 = arith.constant 0 : index
    %17 = vector.load %arg19[%c0_33, %c0_34] : memref<1x16xf32, #tpu.memory_space<vmem>>, vector<1x16xf32>
    %c0_35 = arith.constant 0 : index
    %c0_36 = arith.constant 0 : index
    %18 = vector.load %arg20[%c0_35, %c0_36] : memref<16x128xbf16, #tpu.memory_space<vmem>>, vector<16x128xbf16>
    %c0_37 = arith.constant 0 : index
    %c0_38 = arith.constant 0 : index
    %19 = vector.load %arg21[%c0_37, %c0_38] : memref<1x128xf32, #tpu.memory_space<vmem>>, vector<1x128xf32>
    %c0_39 = arith.constant 0 : index
    %c0_40 = arith.constant 0 : index
    %20 = vector.load %arg1[%c0_39, %c0_40] : memref<8x7xf32, #tpu.memory_space<vmem>>, vector<8x7xf32>
    %21 = arith.truncf %20 : vector<8x7xf32> to vector<8x7xbf16>
    %cst = arith.constant dense<0.000000e+00> : vector<8x24xf32>
    %22 = tpu.matmul %21, %0, %cst {dimension_numbers = #tpu.dot_dimension_numbers<[1], [0], [0], [1], [0, 0, 1, 1], [], []>} : vector<8x7xbf16>, vector<7x24xbf16>, vector<8x24xf32> -> vector<8x24xf32>
    %23 = arith.truncf %20 : vector<8x7xf32> to vector<8x7xbf16>
    %cst_41 = arith.constant dense<0.000000e+00> : vector<8x24xf32>
    %24 = tpu.matmul %23, %1, %cst_41 {dimension_numbers = #tpu.dot_dimension_numbers<[1], [0], [0], [1], [0, 0, 1, 1], [], []>} : vector<8x7xbf16>, vector<7x24xbf16>, vector<8x24xf32> -> vector<8x24xf32>
    %25 = arith.maximumf %22, %24 : vector<8x24xf32>
    %26 = vector.broadcast %2 : vector<1x24xf32> to vector<8x24xf32>
    %27 = arith.addf %25, %26 : vector<8x24xf32>
    %cst_42 = arith.constant 0.000000e+00 : f32
    %28 = vector.broadcast %cst_42 : f32 to vector<8x24xf32>
    %29 = arith.maximumf %27, %28 : vector<8x24xf32>
    %30 = arith.truncf %29 : vector<8x24xf32> to vector<8x24xbf16>
    %cst_43 = arith.constant dense<0.000000e+00> : vector<8x32xf32>
    %31 = tpu.matmul %30, %3, %cst_43 {dimension_numbers = #tpu.dot_dimension_numbers<[1], [0], [0], [1], [0, 0, 1, 1], [], []>} : vector<8x24xbf16>, vector<24x32xbf16>, vector<8x32xf32> -> vector<8x32xf32>
    %32 = arith.truncf %29 : vector<8x24xf32> to vector<8x24xbf16>
    %cst_44 = arith.constant dense<0.000000e+00> : vector<8x32xf32>
    %33 = tpu.matmul %32, %4, %cst_44 {dimension_numbers = #tpu.dot_dimension_numbers<[1], [0], [0], [1], [0, 0, 1, 1], [], []>} : vector<8x24xbf16>, vector<24x32xbf16>, vector<8x32xf32> -> vector<8x32xf32>
    %34 = arith.maximumf %31, %33 : vector<8x32xf32>
    %35 = vector.broadcast %5 : vector<1x32xf32> to vector<8x32xf32>
    %36 = arith.addf %34, %35 : vector<8x32xf32>
    %cst_45 = arith.constant 0.000000e+00 : f32
    %37 = vector.broadcast %cst_45 : f32 to vector<8x32xf32>
    %38 = arith.maximumf %36, %37 : vector<8x32xf32>
    %39 = arith.truncf %38 : vector<8x32xf32> to vector<8x32xbf16>
    %cst_46 = arith.constant dense<0.000000e+00> : vector<8x64xf32>
    %40 = tpu.matmul %39, %6, %cst_46 {dimension_numbers = #tpu.dot_dimension_numbers<[1], [0], [0], [1], [0, 0, 1, 1], [], []>} : vector<8x32xbf16>, vector<32x64xbf16>, vector<8x64xf32> -> vector<8x64xf32>
    %41 = vector.broadcast %7 : vector<1x64xf32> to vector<8x64xf32>
    %42 = arith.addf %40, %41 : vector<8x64xf32>
    %cst_47 = arith.constant 0.000000e+00 : f32
    %43 = vector.broadcast %cst_47 : f32 to vector<8x64xf32>
    %44 = arith.maximumf %42, %43 : vector<8x64xf32>
    %45 = arith.truncf %44 : vector<8x64xf32> to vector<8x64xbf16>
    %cst_48 = arith.constant dense<0.000000e+00> : vector<8x128xf32>
    %46 = tpu.matmul %45, %8, %cst_48 {dimension_numbers = #tpu.dot_dimension_numbers<[1], [0], [0], [1], [0, 0, 1, 1], [], []>} : vector<8x64xbf16>, vector<64x128xbf16>, vector<8x128xf32> -> vector<8x128xf32>
    %47 = vector.broadcast %9 : vector<1x128xf32> to vector<8x128xf32>
    %48 = arith.addf %46, %47 : vector<8x128xf32>
    %49 = arith.truncf %48 : vector<8x128xf32> to vector<8x128xbf16>
    %cst_49 = arith.constant dense<0.000000e+00> : vector<8x24xf32>
    %50 = tpu.matmul %49, %10, %cst_49 {dimension_numbers = #tpu.dot_dimension_numbers<[1], [0], [0], [1], [0, 0, 1, 1], [], []>} : vector<8x128xbf16>, vector<128x24xbf16>, vector<8x24xf32> -> vector<8x24xf32>
    %51 = arith.truncf %48 : vector<8x128xf32> to vector<8x128xbf16>
    %cst_50 = arith.constant dense<0.000000e+00> : vector<8x24xf32>
    %52 = tpu.matmul %51, %11, %cst_50 {dimension_numbers = #tpu.dot_dimension_numbers<[1], [0], [0], [1], [0, 0, 1, 1], [], []>} : vector<8x128xbf16>, vector<128x24xbf16>, vector<8x24xf32> -> vector<8x24xf32>
    %53 = arith.maximumf %50, %52 : vector<8x24xf32>
    %54 = vector.broadcast %12 : vector<1x24xf32> to vector<8x24xf32>
    %55 = arith.addf %53, %54 : vector<8x24xf32>
    %cst_51 = arith.constant 0.000000e+00 : f32
    %56 = vector.broadcast %cst_51 : f32 to vector<8x24xf32>
    %57 = arith.maximumf %55, %56 : vector<8x24xf32>
    %58 = arith.truncf %57 : vector<8x24xf32> to vector<8x24xbf16>
    %cst_52 = arith.constant dense<0.000000e+00> : vector<8x32xf32>
    %59 = tpu.matmul %58, %13, %cst_52 {dimension_numbers = #tpu.dot_dimension_numbers<[1], [0], [0], [1], [0, 0, 1, 1], [], []>} : vector<8x24xbf16>, vector<24x32xbf16>, vector<8x32xf32> -> vector<8x32xf32>
    %60 = arith.truncf %57 : vector<8x24xf32> to vector<8x24xbf16>
    %cst_53 = arith.constant dense<0.000000e+00> : vector<8x32xf32>
    %61 = tpu.matmul %60, %14, %cst_53 {dimension_numbers = #tpu.dot_dimension_numbers<[1], [0], [0], [1], [0, 0, 1, 1], [], []>} : vector<8x24xbf16>, vector<24x32xbf16>, vector<8x32xf32> -> vector<8x32xf32>
    %62 = arith.maximumf %59, %61 : vector<8x32xf32>
    %63 = vector.broadcast %15 : vector<1x32xf32> to vector<8x32xf32>
    %64 = arith.addf %62, %63 : vector<8x32xf32>
    %cst_54 = arith.constant 0.000000e+00 : f32
    %65 = vector.broadcast %cst_54 : f32 to vector<8x32xf32>
    %66 = arith.maximumf %64, %65 : vector<8x32xf32>
    %67 = arith.truncf %66 : vector<8x32xf32> to vector<8x32xbf16>
    %cst_55 = arith.constant dense<0.000000e+00> : vector<8x16xf32>
    %68 = tpu.matmul %67, %16, %cst_55 {dimension_numbers = #tpu.dot_dimension_numbers<[1], [0], [0], [1], [0, 0, 1, 1], [], []>} : vector<8x32xbf16>, vector<32x16xbf16>, vector<8x16xf32> -> vector<8x16xf32>
    %69 = vector.broadcast %17 : vector<1x16xf32> to vector<8x16xf32>
    %70 = arith.addf %68, %69 : vector<8x16xf32>
    %cst_56 = arith.constant 0.000000e+00 : f32
    %71 = vector.broadcast %cst_56 : f32 to vector<8x16xf32>
    %72 = arith.maximumf %70, %71 : vector<8x16xf32>
    %73 = arith.truncf %72 : vector<8x16xf32> to vector<8x16xbf16>
    %cst_57 = arith.constant dense<0.000000e+00> : vector<8x128xf32>
    %74 = tpu.matmul %73, %18, %cst_57 {dimension_numbers = #tpu.dot_dimension_numbers<[1], [0], [0], [1], [0, 0, 1, 1], [], []>} : vector<8x16xbf16>, vector<16x128xbf16>, vector<8x128xf32> -> vector<8x128xf32>
    %75 = vector.broadcast %19 : vector<1x128xf32> to vector<8x128xf32>
    %76 = arith.addf %74, %75 : vector<8x128xf32>
    %77 = arith.addf %48, %76 : vector<8x128xf32>
    %c0_58 = arith.constant 0 : index
    %c0_59 = arith.constant 0 : index
    %78 = vector.load %arg22[%c0_58, %c0_59] : memref<8x128xf32, #tpu.memory_space<vmem>>, vector<8x128xf32>
    tpu.vector_store %arg22[%c0_58, %c0_59], %77 {strides = array<i32>} : memref<8x128xf32, #tpu.memory_space<vmem>>, vector<8x128xf32>,
    return
  }
  func.func @transform_0(%arg0: i32) -> (i32, i32) {
    %c0_i32 = arith.constant 0 : i32
    %c0_i32_0 = arith.constant 0 : i32
    return %arg0, %c0_i32 : i32, i32
  }
  func.func @transform_1(%arg0: i32) -> (i32, i32) {
    %c0_i32 = arith.constant 0 : i32
    %c0_i32_0 = arith.constant 0 : i32
    %c0_i32_1 = arith.constant 0 : i32
    return %c0_i32, %c0_i32_0 : i32, i32
  }
  func.func @transform_2(%arg0: i32) -> (i32, i32) {
    %c0_i32 = arith.constant 0 : i32
    %c0_i32_0 = arith.constant 0 : i32
    %c0_i32_1 = arith.constant 0 : i32
    return %c0_i32, %c0_i32_0 : i32, i32
  }
  func.func @transform_3(%arg0: i32) -> (i32, i32) {
    %c0_i32 = arith.constant 0 : i32
    %c0_i32_0 = arith.constant 0 : i32
    %c0_i32_1 = arith.constant 0 : i32
    return %c0_i32, %c0_i32_0 : i32, i32
  }
  func.func @transform_4(%arg0: i32) -> (i32, i32) {
    %c0_i32 = arith.constant 0 : i32
    %c0_i32_0 = arith.constant 0 : i32
    %c0_i32_1 = arith.constant 0 : i32
    return %c0_i32, %c0_i32_0 : i32, i32
  }
  func.func @transform_5(%arg0: i32) -> (i32, i32) {
    %c0_i32 = arith.constant 0 : i32
    %c0_i32_0 = arith.constant 0 : i32
    %c0_i32_1 = arith.constant 0 : i32
    return %c0_i32, %c0_i32_0 : i32, i32
  }
  func.func @transform_6(%arg0: i32) -> (i32, i32) {
    %c0_i32 = arith.constant 0 : i32
    %c0_i32_0 = arith.constant 0 : i32
    %c0_i32_1 = arith.constant 0 : i32
    return %c0_i32, %c0_i32_0 : i32, i32
  }
  func.func @transform_7(%arg0: i32) -> (i32, i32) {
    %c0_i32 = arith.constant 0 : i32
    %c0_i32_0 = arith.constant 0 : i32
    %c0_i32_1 = arith.constant 0 : i32
    return %c0_i32, %c0_i32_0 : i32, i32
  }
  func.func @transform_8(%arg0: i32) -> (i32, i32) {
    %c0_i32 = arith.constant 0 : i32
    %c0_i32_0 = arith.constant 0 : i32
    %c0_i32_1 = arith.constant 0 : i32
    return %c0_i32, %c0_i32_0 : i32, i32
  }
  func.func @transform_9(%arg0: i32) -> (i32, i32) {
    %c0_i32 = arith.constant 0 : i32
    %c0_i32_0 = arith.constant 0 : i32
    %c0_i32_1 = arith.constant 0 : i32
    return %c0_i32, %c0_i32_0 : i32, i32
  }
  func.func @transform_10(%arg0: i32) -> (i32, i32) {
    %c0_i32 = arith.constant 0 : i32
    %c0_i32_0 = arith.constant 0 : i32
    %c0_i32_1 = arith.constant 0 : i32
    return %c0_i32, %c0_i32_0 : i32, i32
  }
  func.func @transform_11(%arg0: i32) -> (i32, i32) {
    %c0_i32 = arith.constant 0 : i32
    %c0_i32_0 = arith.constant 0 : i32
    %c0_i32_1 = arith.constant 0 : i32
    return %c0_i32, %c0_i32_0 : i32, i32
  }
  func.func @transform_12(%arg0: i32) -> (i32, i32) {
    %c0_i32 = arith.constant 0 : i32
    %c0_i32_0 = arith.constant 0 : i32
    %c0_i32_1 = arith.constant 0 : i32
    return %c0_i32, %c0_i32_0 : i32, i32
  }
  func.func @transform_13(%arg0: i32) -> (i32, i32) {
    %c0_i32 = arith.constant 0 : i32
    %c0_i32_0 = arith.constant 0 : i32
    %c0_i32_1 = arith.constant 0 : i32
    return %c0_i32, %c0_i32_0 : i32, i32
  }
  func.func @transform_14(%arg0: i32) -> (i32, i32) {
    %c0_i32 = arith.constant 0 : i32
    %c0_i32_0 = arith.constant 0 : i32
    %c0_i32_1 = arith.constant 0 : i32
    return %c0_i32, %c0_i32_0 : i32, i32
  }
  func.func @transform_15(%arg0: i32) -> (i32, i32) {
    %c0_i32 = arith.constant 0 : i32
    %c0_i32_0 = arith.constant 0 : i32
    %c0_i32_1 = arith.constant 0 : i32
    return %c0_i32, %c0_i32_0 : i32, i32
  }
  func.func @transform_16(%arg0: i32) -> (i32, i32) {
    %c0_i32 = arith.constant 0 : i32
    %c0_i32_0 = arith.constant 0 : i32
    %c0_i32_1 = arith.constant 0 : i32
    return %c0_i32, %c0_i32_0 : i32, i32
  }
  func.func @transform_17(%arg0: i32) -> (i32, i32) {
    %c0_i32 = arith.constant 0 : i32
    %c0_i32_0 = arith.constant 0 : i32
    %c0_i32_1 = arith.constant 0 : i32
    return %c0_i32, %c0_i32_0 : i32, i32
  }
  func.func @transform_18(%arg0: i32) -> (i32, i32) {
    %c0_i32 = arith.constant 0 : i32
    %c0_i32_0 = arith.constant 0 : i32
    %c0_i32_1 = arith.constant 0 : i32
    return %c0_i32, %c0_i32_0 : i32, i32
  }
  func.func @transform_19(%arg0: i32) -> (i32, i32) {
    %c0_i32 = arith.constant 0 : i32
    %c0_i32_0 = arith.constant 0 : i32
    %c0_i32_1 = arith.constant 0 : i32
    return %c0_i32, %c0_i32_0 : i32, i32
  }
  func.func @transform_20(%arg0: i32) -> (i32, i32) {
    %c0_i32 = arith.constant 0 : i32
    %c0_i32_0 = arith.constant 0 : i32
    %c0_i32_1 = arith.constant 0 : i32
    return %c0_i32, %c0_i32_0 : i32, i32
  }
  func.func @transform_21(%arg0: i32) -> (i32, i32) {
    %c0_i32 = arith.constant 0 : i32
    %c0_i32_0 = arith.constant 0 : i32
    return %arg0, %c0_i32 : i32, i32
  }
}

</mosaic_0001>

<bundles_post_ra>
// kernel: tpu_custom_call.1
= control target key start
LH: loop header
LB: loop body
LE: loop exit
PB: predicated region body
PF: predicated region fallthrough
CT: control target
= control target key end

     0   :  { %s1542_s0 = inlined_call_operand.vmem [shape: f32[8,7], index: 0, kind: input, shape index: {}]   ;;  %s1543_s1 = inlined_call_operand.vmem [shape: bf16[7,24], index: 1, kind: input, shape index: {}]   ;;  %s1544_s2 = inlined_call_operand.vmem [shape: bf16[7,24], index: 2, kind: input, shape index: {}]   ;;  %s1545_s3 = inlined_call_operand.vmem [shape: f32[1,24], index: 3, kind: input, shape index: {}]   ;;  %s1546_s4 = inlined_call_operand.vmem [shape: bf16[24,32], index: 4, kind: input, shape index: {}]   ;;  %s1547_s5 = inlined_call_operand.vmem [shape: bf16[24,32], index: 5, kind: input, shape index: {}]   ;;  %s1548_s6 = inlined_call_operand.vmem [shape: f32[1,32], index: 6, kind: input, shape index: {}]   ;;  %s1549_s7 = inlined_call_operand.vmem [shape: bf16[32,64], index: 7, kind: input, shape index: {}]   ;;  %s1550_s8 = inlined_call_operand.vmem [shape: f32[1,64], index: 8, kind: input, shape index: {}]   ;;  %s1551_s9 = inlined_call_operand.vmem [shape: bf16[64,128], index: 9, kind: input, shape index: {}]   ;;  %s1552_s10 = inlined_call_operand.vmem [shape: f32[1,128], index: 10, kind: input, shape index: {}]   ;;  %s1553_s11 = inlined_call_operand.vmem [shape: bf16[128,24], index: 11, kind: input, shape index: {}]   ;;  %s1554_s12 = inlined_call_operand.vmem [shape: bf16[128,24], index: 12, kind: input, shape index: {}]   ;;  %s1555_s13 = inlined_call_operand.vmem [shape: f32[1,24], index: 13, kind: input, shape index: {}]   ;;  %s1556_s14 = inlined_call_operand.vmem [shape: bf16[24,32], index: 14, kind: input, shape index: {}]   ;;  %s1557_s15 = inlined_call_operand.vmem [shape: bf16[24,32], index: 15, kind: input, shape index: {}]   ;;  %s1558_s16 = inlined_call_operand.vmem [shape: f32[1,32], index: 16, kind: input, shape index: {}]   ;;  %s1559_s17 = inlined_call_operand.vmem [shape: bf16[32,16], index: 17, kind: input, shape index: {}]   ;;  %s1560_s18 = inlined_call_operand.vmem [shape: f32[1,16], index: 18, kind: input, shape index: {}]   ;;  %s1561_s19 = inlined_call_operand.vmem [shape: bf16[16,128], index: 19, kind: input, shape index: {}]   ;;  %s1562_s20 = inlined_call_operand.vmem [shape: f32[1,128], index: 20, kind: input, shape index: {}]   ;;  %s1563_s21 = inlined_call_operand.hbm [shape: f32[8,128], index: 21, kind: output, shape index: {}]  }
   0x1   :  { %1566 = sst [smem:[#allocation5_spill]] %s1542_s0 }
   0x2   :  { %1567 = sst [smem:[#allocation6_spill]] %s1543_s1 }
   0x3   :  { %1568 = sst [smem:[#allocation7_spill]] %s1544_s2 }
   0x4   :  { %1569 = sst [smem:[#allocation8_spill]] %s1545_s3 }
   0x5   :  { %1570 = sst [smem:[#allocation9_spill]] %s1546_s4 }
   0x6   :  { %1571 = sst [smem:[#allocation10_spill]] %s1547_s5 }
   0x7   :  { %s1572_s26 = sld [smem:[#allocation6_spill]]  ;;  %vm148_vm0 = vcmask 1042432   ;;  %vm149_vm1 = vcmask 1043456   ;;  %v1218_v1 = vmov 0.0   ;;  %v1219_v2 = vmov 65535  }
   0x8   :  { %1041 = vmatprep.subr.bf16.mxu0 %v1218_v1  ;;  %1047 = vmatprep.subr.bf16.mxu1 %v1218_v1  ;;  %v150_v3 = vsel %vm148_vm0, 4294967295, %v1219_v2  ;;  %s1573_s28 = sld [smem:[#allocation7_spill]]  ;;  %vm1220_vm2 = vmmov 0   ;;  %vm144_vm3 = vcmask 56320  }
   0x9   :  { %s1574_s4 = sld [smem:[#allocation5_spill]]  ;;  %v151_v6 = vsel %vm149_vm1, %v150_v3, 0  ;;  %1043 = vmatprep.mubr.msk.bf16.mxu0 %vm1220_vm2, %v1218_v1  ;;  %1049 = vmatprep.mubr.msk.bf16.mxu1 %vm1220_vm2, %v1218_v1 }
   0xd   :  { %v70_v0 = vld [vmem:[%s1572_s26] sm:$0xf] }
   0xe   :  { %v71_v4 = vld [vmem:[%s1573_s28] sm:$0xf]  ;;  %v153_v7 = vand.u32 %v151_v6, %v70_v0 }
   0xf   :  { %v142_v5 = vld [vmem:[%s1574_s4] sm:$0xff]  ;;  %v196_v8 = vand.u32 %v151_v6, %v71_v4 }
  0x10   :  { %v143_v9 = vpack.c.bf16 %v142_v5, %v142_v5  ;;  %1042 = vmatpush3.bf16.msra.mxu0 %v153_v7 }
  0x11   :  { %1048 = vmatpush3.bf16.msra.mxu1 %v196_v8  ;;  %1053 = vmatprep.subr.bf16.mxu0 %v1218_v1 }
  0x12   :  { %1061 = vmatprep.subr.bf16.mxu1 %v1218_v1 }
  0x13   :  { %1044 = vmatmul.mubr.msk.bf16.vlgmr.msra.gmra.mxu0 %vm144_vm3, %v143_v9 }
  0x14   :  { %1050 = vmatmul.mubr.msk.bf16.vlgmr.msra.gmra.mxu1 %vm144_vm3, %v143_v9  ;;  %1057 = vmatprep.mubr.msk.bf16.mxu0 %vm1220_vm2, %v1218_v1 }
  0x15   :  { %1065 = vmatprep.mubr.msk.bf16.mxu1 %vm1220_vm2, %v1218_v1 }
  0x16   :  { %26 = vsyncpa [#allocation3], 0  ;;  %s1575_s22 = sld [smem:[#allocation9_spill]]  ;;  %vm257_vm4 = vcmask 195584   ;;  %v1167_v29 = vld [vmem:[%s1549_s7 + $0x8] sm:$0xff]   ;;  %v1168_v30 = vld [vmem:[%s1549_s7] sm:$0xff]  }
  0x17   :  { %s1576_s24 = sld [smem:[#allocation10_spill]]  ;;  %v1169_v31 = vld [vmem:[%s1551_s9 + $0x18] sm:$0xff]   ;;  %v1170_v32 = vld [vmem:[%s1551_s9 + $0x10] sm:$0xff]   ;;  %v952_v34 = vld [vmem:[%s1548_s6] ss:$0 sm:$0xff]  ;;  %vm384_vm5 = vcmask 261120  }
  0x18   :  { %s1577_s29 = sld [smem:[#allocation8_spill]]  ;;  %v1171_v46 = vld [vmem:[%s1551_s9 + $0x8] sm:$0xff]   ;;  %v1172_v47 = vld [vmem:[%s1551_s9] sm:$0xff]   ;;  %v1173_v48 = vld [vmem:[%s1553_s11 + $0x38] sm:$0xff]   ;;  %vm460_vm6 = vcmask 523264   ;;  %vm883_vm7 = vcmask 130048  }
  0x19   :  { %v1175_v49 = vld [vmem:[%s1553_s11 + $0x30] sm:$0xff]   ;;  %v1177_v50 = vld [vmem:[%s1553_s11 + $0x28] sm:$0xff]   ;;  %v1179_v51 = vld [vmem:[%s1553_s11 + $0x20] sm:$0xff]  }
  0x1a   :  { %v1181_v52 = vld [vmem:[%s1553_s11 + $0x18] sm:$0xff]   ;;  %v1183_v53 = vld [vmem:[%s1553_s11 + $0x10] sm:$0xff]   ;;  %v1185_v54 = vld [vmem:[%s1553_s11 + $0x8] sm:$0xff]  }
  0x1b   :  { %v953_v55 = vld [vmem:[%s1550_s8] ss:$0 sm:$0xff]  ;;  %v1174_v61 = vld [vmem:[%s1554_s12 + $0x38] sm:$0xff]   ;;  %v1176_v0 = vld [vmem:[%s1554_s12 + $0x30] sm:$0xff]  }
  0x1c   :  { %v1163_v10 = vld [vmem:[%s1575_s22 + $0x8] ss:$0 sps:$4 sm:$0xff]   ;;  %v1165_v14 = vld [vmem:[%s1575_s22] sm:$0xff]   ;;  %v1182_v4 = vld [vmem:[%s1554_s12 + $0x18] sm:$0xff]  }
  0x1d   :  { %v1164_v11 = vld [vmem:[%s1576_s24 + $0x8] ss:$0 sps:$4 sm:$0xff]   ;;  %v262_v12 = vsel %vm149_vm1, %v1163_v10, 0  ;;  %v1166_v15 = vld [vmem:[%s1576_s24] sm:$0xff]   ;;  %v1184_v5 = vld [vmem:[%s1554_s12 + $0x10] sm:$0xff]   ;;  %s1221_s24 = smov [#allocation2]  }
  0x1e   :  { %v314_v13 = vsel %vm149_vm1, %v1164_v11, 0  ;;  %1054 = vmatpush3.bf16.msra.mxu0 %v262_v12  ;;  %v945_v17 = vld [vmem:[%s1577_s29] ss:$0 sm:$0xff]  ;;  %v1178_v2 = vld [vmem:[%s1554_s12 + $0x28] sm:$0xff]   ;;  %s935_s2 = sshll.u32 %s1221_s24, 4  ;;  %s936_s2 = int_to_ptr.vmem [resolvable:$true] %s935_s2 }
  0x1f   :  { %1062 = vmatpush3.bf16.msra.mxu1 %v314_v13  ;;  %1055 = vmatprep.subr.bf16.mxu0 %v1218_v1  ;;  %v1180_v3 = vld [vmem:[%s1554_s12 + $0x20] sm:$0xff]   ;;  %v1186_v6 = vld [vmem:[%s1554_s12 + $0x8] sm:$0xff]   ;;  %p1201_p1 = scmp.lt.s32.totalorder %s936_s2, %s936_s2 }
  0x20   :  { %1063 = vmatprep.subr.bf16.mxu1 %v1218_v1  ;;  %v1187_v7 = vld [vmem:[%s1553_s11] sm:$0xff]  }
  0x21   :  { %v1188_v8 = vld [vmem:[%s1554_s12] sm:$0xff]  }
  0x22   :  { %1056 = vmatpush3.bf16.msra.mxu0 %v1165_v14  ;;  %v957_v9 = vld [vmem:[%s1552_s10] ss:$0 sm:$0xff] }
  0x23   :  { %1064 = vmatpush3.bf16.msra.mxu1 %v1166_v15  ;;  %1069 = vmatprep.subr.bf16.mxu0 %v1218_v1 }
  0x24   :  { %1077 = vmatprep.subr.bf16.mxu1 %v1218_v1 }
  0xd3   :  { %v189_v16 = vpop.f32.mrf.mxu0 }
  0xd4   :  { %v232_v18 = vpop.f32.mrf.mxu1 }
  0xd5   :  { %v238_v19 = vmax.f32 %v189_v16, %v232_v18  ;;  %v1045_v20 = vpop.f32.mrf.mxu0  ;;  %v1189_v16 = vld [vmem:[%s1556_s14 + $0x8] ss:$0 sps:$4 sm:$0xff]   ;;  %v1190_v18 = vld [vmem:[%s1556_s14] sm:$0xff]  }
  0xd6   :  { %v1051_v21 = vpop.f32.mrf.mxu1  ;;  %v979_v20 = vld [vmem:[%s1555_s13] ss:$0 sm:$0xff] }
  0xd7   :  { %v245_v22 = vadd.f32 %v945_v17, %v238_v19  ;;  %v192_v23 = vpop.f32.mrf.mxu0  ;;  %v704_v17 = vsel %vm149_vm1, %v1189_v16, 0 }
  0xd8   :  { %v235_v24 = vpop.f32.mrf.mxu1 }
  0xd9   :  { %v246_v25 = vmax.f32 %v245_v22, 0.0  ;;  %v1046_v26 = vpop.f32.mrf.mxu0 }
  0xda   :  { %v1052_v27 = vpop.f32.mrf.mxu1  ;;  %v1191_v26 = vld [vmem:[%s1557_s15 + $0x8] ss:$0 sps:$4 sm:$0xff]  }
  0xdb   :  { %v247_v28 = vpack.c.bf16 %v246_v25, %v246_v25 }
  0xdd   :  { %1058 = vmatmul.mubr.msk.bf16.vlgmr.msra.gmra.mxu0 %vm257_vm4, %v247_v28  ;;  %1066 = vmatmul.mubr.msk.bf16.vlgmr.msra.gmra.mxu1 %vm257_vm4, %v247_v28 }
  0xde   :  { %1073 = vmatprep.mubr.msk.bf16.mxu0 %vm1220_vm2, %v1218_v1  ;;  %1085 = vmatprep.mubr.msk.bf16.mxu1 %vm1220_vm2, %v1218_v1 }
  0xdf   :  { %1070 = vmatpush3.bf16.msra.mxu0 %v1167_v29  ;;  %1078 = vmatpush3.bf16.msra.mxu1 %v1169_v31 }
  0xe0   :  { %1071 = vmatprep.subr.bf16.mxu0 %v1218_v1  ;;  %1079 = vmatprep.subr.bf16.mxu1 %v1218_v1 }
  0xe3   :  { %1072 = vmatpush3.bf16.msra.mxu0 %v1168_v30  ;;  %1080 = vmatpush3.bf16.msra.mxu1 %v1170_v32 }
  0xe4   :  { %1089 = vmatprep.subr.bf16.mxu0 %v1218_v1  ;;  %1081 = vmatprep.subr.bf16.mxu1 %v1218_v1 }
  0xe7   :  { %1082 = vmatpush3.bf16.msra.mxu1 %v1171_v46 }
  0xe8   :  { %1083 = vmatprep.subr.bf16.mxu1 %v1218_v1 }
  0xeb   :  { %1084 = vmatpush3.bf16.msra.mxu1 %v1172_v47 }
  0xec   :  { %1109 = vmatprep.subr.bf16.mxu1 %v1218_v1 }
 0x19d   :  { %v298_v33 = vpop.f32.mrf.mxu0  ;;  %v350_v35 = vpop.f32.mrf.mxu1 }
 0x19e   :  { %v356_v36 = vmax.f32 %v298_v33, %v350_v35  ;;  %v756_v33 = vsel %vm149_vm1, %v1191_v26, 0  ;;  %v1193_v35 = vld [vmem:[%s1559_s17 + $0x8] sm:$0xff]  }
 0x19f   :  { %v1059_v37 = vpop.f32.mrf.mxu0  ;;  %v1067_v38 = vpop.f32.mrf.mxu1 }
 0x1a0   :  { %v363_v39 = vadd.f32 %v952_v34, %v356_v36  ;;  %v1192_v34 = vld [vmem:[%s1557_s15] sm:$0xff]  }
 0x1a1   :  { %v301_v40 = vpop.f32.mrf.mxu0  ;;  %v353_v41 = vpop.f32.mrf.mxu1  ;;  %v1194_v36 = vld [vmem:[%s1559_s17] sm:$0xff]  }
 0x1a2   :  { %v364_v42 = vmax.f32 %v363_v39, 0.0  ;;  %v1195_v37 = vld [vmem:[%s1561_s19] sm:$0xff]  }
 0x1a3   :  { %v1060_v43 = vpop.f32.mrf.mxu0  ;;  %v1068_v44 = vpop.f32.mrf.mxu1 }
 0x1a4   :  { %v365_v45 = vpack.c.bf16 %v364_v42, %v364_v42  ;;  %v986_v42 = vld [vmem:[%s1558_s16] ss:$0 sm:$0xff] }
 0x1a6   :  { %1074 = vmatmul.mubr.msk.bf16.vlgmr.msra.gmra.mxu0 %vm384_vm5, %v365_v45 }
 0x1a7   :  { %1105 = vmatprep.mubr.msk.bf16.mxu0 %vm1220_vm2, %v1218_v1  ;;  %1090 = vmatpush3.bf16.msra.mxu0 %v1173_v48 }
 0x1a8   :  { %1091 = vmatprep.subr.bf16.mxu0 %v1218_v1 }
 0x1ab   :  { %1092 = vmatpush3.bf16.msra.mxu0 %v1175_v49 }
 0x1ac   :  { %1093 = vmatprep.subr.bf16.mxu0 %v1218_v1 }
 0x1af   :  { %1094 = vmatpush3.bf16.msra.mxu0 %v1177_v50  ;;  %v987_v50 = vld [vmem:[%s1560_s18] ss:$0 sm:$0xff]  ;;  %s1196_s18 = scalar_lea.vmem %s936_s2, 128 }
 0x1b0   :  { %1095 = vmatprep.subr.bf16.mxu0 %v1218_v1  ;;  %p1197_p0 = scmp.ne.s32.totalorder %s936_s2, %s1196_s18  ;;  %p1202_p2 = scmp.lt.s32.totalorder %s1196_s18, %s1196_s18 }
 0x1b2   :  { %p1203_p3 = por %p1202_p2, %p1201_p1 }
 0x1b3   :  { %1096 = vmatpush3.bf16.msra.mxu0 %v1179_v51 }
 0x1b4   :  { %1097 = vmatprep.subr.bf16.mxu0 %v1218_v1  ;;  %p1204_p4 = pnand %p1203_p3, %p1197_p0 }
 0x1b7   :  { %1098 = vmatpush3.bf16.msra.mxu0 %v1181_v52 }
 0x1b8   :  { %1099 = vmatprep.subr.bf16.mxu0 %v1218_v1 }
 0x1bb   :  { %1100 = vmatpush3.bf16.msra.mxu0 %v1183_v53 }
 0x1bc   :  { %1101 = vmatprep.subr.bf16.mxu0 %v1218_v1 }
 0x1bf   :  { %1102 = vmatpush3.bf16.msra.mxu0 %v1185_v54 }
 0x1c0   :  { %1103 = vmatprep.subr.bf16.mxu0 %v1218_v1 }
 0x1c3   :  { %1104 = vmatpush3.bf16.msra.mxu0 %v1187_v7 }
 0x1c4   :  { %1129 = vmatprep.subr.bf16.mxu0 %v1218_v1 }
 0x266   :  { %v422_v56 = vpop.f32.mrf.mxu0 }
 0x267   :  { %v423_v57 = vadd.f32 %v953_v55, %v422_v56 }
 0x268   :  { %v1075_v58 = vpop.f32.mrf.mxu0 }
 0x269   :  { %v428_v59 = vmax.f32 %v423_v57, 0.0  ;;  %v991_v58 = vld [vmem:[%s1562_s20] ss:$0 sm:$0xff] }
 0x26a   :  { %v425_v60 = vpop.f32.mrf.mxu0 }
 0x26b   :  { %v429_v62 = vpack.c.bf16 %v428_v59, %v428_v59 }
 0x26c   :  { %v1076_v63 = vpop.f32.mrf.mxu0 }
 0x26d   :  { %1086 = vmatmul.mubr.msk.bf16.vlgmr.msra.gmra.mxu1 %vm460_vm6, %v429_v62 }
 0x26e   :  { %1110 = vmatpush3.bf16.msra.mxu1 %v1174_v61  ;;  %1125 = vmatprep.mubr.msk.bf16.mxu1 %vm1220_vm2, %v1218_v1 }
 0x26f   :  { %1111 = vmatprep.subr.bf16.mxu1 %v1218_v1 }
 0x272   :  { %1112 = vmatpush3.bf16.msra.mxu1 %v1176_v0 }
 0x273   :  { %1113 = vmatprep.subr.bf16.mxu1 %v1218_v1 }
 0x276   :  { %1114 = vmatpush3.bf16.msra.mxu1 %v1178_v2 }
 0x277   :  { %1115 = vmatprep.subr.bf16.mxu1 %v1218_v1 }
 0x27a   :  { %1116 = vmatpush3.bf16.msra.mxu1 %v1180_v3 }
 0x27b   :  { %1117 = vmatprep.subr.bf16.mxu1 %v1218_v1 }
 0x27e   :  { %1118 = vmatpush3.bf16.msra.mxu1 %v1182_v4 }
 0x27f   :  { %1119 = vmatprep.subr.bf16.mxu1 %v1218_v1 }
 0x282   :  { %1120 = vmatpush3.bf16.msra.mxu1 %v1184_v5 }
 0x283   :  { %1121 = vmatprep.subr.bf16.mxu1 %v1218_v1 }
 0x286   :  { %1122 = vmatpush3.bf16.msra.mxu1 %v1186_v6 }
 0x287   :  { %1123 = vmatprep.subr.bf16.mxu1 %v1218_v1 }
 0x28a   :  { %1124 = vmatpush3.bf16.msra.mxu1 %v1188_v8 }
 0x28b   :  { %1145 = vmatprep.subr.bf16.mxu1 %v1218_v1 }
 0x32d   :  { %v498_v10 = vpop.f32.mrf.mxu1 }
 0x32e   :  { %v1483_v11 = vadd.f32 %v957_v9, %v498_v10 }
 0x32f   :  { %v1087_v12 = vpop.f32.mrf.mxu1 }
 0x330   :  { %v504_v13 = vpack.c.bf16 %v1483_v11, %v1483_v11 }
 0x331   :  { %v501_v14 = vpop.f32.mrf.mxu1 }
 0x332   :  { %1106 = vmatmul.mubr.bf16.vlgmr.msra.gmra.mxu0 %v504_v13  ;;  %1126 = vmatmul.mubr.bf16.vlgmr.msra.gmra.mxu1 %v504_v13 }
 0x333   :  { %v1088_v15 = vpop.f32.mrf.mxu1  ;;  %1133 = vmatprep.mubr.msk.bf16.mxu0 %vm1220_vm2, %v1218_v1  ;;  %1149 = vmatprep.mubr.msk.bf16.mxu1 %vm1220_vm2, %v1218_v1 }
 0x334   :  { %1130 = vmatpush3.bf16.msra.mxu0 %v704_v17  ;;  %1146 = vmatpush3.bf16.msra.mxu1 %v1193_v35 }
 0x335   :  { %1131 = vmatprep.subr.bf16.mxu0 %v1218_v1  ;;  %1147 = vmatprep.subr.bf16.mxu1 %v1218_v1 }
 0x338   :  { %1132 = vmatpush3.bf16.msra.mxu0 %v1190_v18  ;;  %1148 = vmatpush3.bf16.msra.mxu1 %v1194_v36 }
 0x339   :  { %1137 = vmatprep.subr.bf16.mxu0 %v1218_v1 }
 0x3f2   :  { %v587_v19 = vpop.f32.mrf.mxu0  ;;  %v675_v21 = vpop.f32.mrf.mxu1 }
 0x3f3   :  { %v681_v22 = vmax.f32 %v587_v19, %v675_v21 }
 0x3f4   :  { %v1107_v23 = vpop.f32.mrf.mxu0  ;;  %v1127_v24 = vpop.f32.mrf.mxu1 }
 0x3f5   :  { %v688_v25 = vadd.f32 %v979_v20, %v681_v22 }
 0x3f6   :  { %v590_v27 = vpop.f32.mrf.mxu0  ;;  %v678_v28 = vpop.f32.mrf.mxu1 }
 0x3f7   :  { %v689_v29 = vmax.f32 %v688_v25, 0.0 }
 0x3f8   :  { %v1108_v30 = vpop.f32.mrf.mxu0  ;;  %v1128_v31 = vpop.f32.mrf.mxu1 }
 0x3f9   :  { %v690_v32 = vpack.c.bf16 %v689_v29, %v689_v29 }
 0x3fb   :  { %1134 = vmatmul.mubr.msk.bf16.vlgmr.msra.gmra.mxu0 %vm257_vm4, %v690_v32 }
 0x3fc   :  { %1138 = vmatpush3.bf16.msra.mxu0 %v756_v33  ;;  %1141 = vmatprep.mubr.msk.bf16.mxu0 %vm1220_vm2, %v1218_v1 }
 0x3fd   :  { %1139 = vmatprep.subr.bf16.mxu0 %v1218_v1 }
 0x400   :  { %1140 = vmatpush3.bf16.msra.mxu0 %v1192_v34 }
 0x401   :  { %1153 = vmatprep.subr.bf16.mxu0 %v1218_v1 }
 0x403   :  { %1142 = vmatmul.mubr.msk.bf16.vlgmr.msra.gmra.mxu0 %vm257_vm4, %v690_v32 }
 0x404   :  { %1155 = vmatprep.mubr.msk.bf16.mxu0 %vm1220_vm2, %v1218_v1  ;;  %1154 = vmatpush3.bf16.msra.mxu0 %v1195_v37 }
 0x4bb   :  { %v740_v38 = vpop.f32.mrf.mxu0 }
 0x4bd   :  { %v1135_v39 = vpop.f32.mrf.mxu0 }
 0x4bf   :  { %v743_v40 = vpop.f32.mrf.mxu0 }
 0x4c1   :  { %v1136_v41 = vpop.f32.mrf.mxu0 }
 0x4c3   :  { %v792_v43 = vpop.f32.mrf.mxu0 }
 0x4c4   :  { %v798_v1 = vmax.f32 %v740_v38, %v792_v43 }
 0x4c5   :  { %v1143_v44 = vpop.f32.mrf.mxu0 }
 0x4c6   :  { %v805_v45 = vadd.f32 %v986_v42, %v798_v1 }
 0x4c7   :  { %v795_v46 = vpop.f32.mrf.mxu0 }
 0x4c8   :  { %v806_v47 = vmax.f32 %v805_v45, 0.0 }
 0x4c9   :  { %v1144_v48 = vpop.f32.mrf.mxu0 }
 0x4ca   :  { %v807_v49 = vpack.c.bf16 %v806_v47, %v806_v47 }
 0x4cc   :  { %1150 = vmatmul.mubr.msk.bf16.vlgmr.msra.gmra.mxu1 %vm384_vm5, %v807_v49 }
 0x58c   :  { %v863_v51 = vpop.f32.mrf.mxu1 }
 0x58d   :  { %v864_v52 = vadd.f32 %v987_v50, %v863_v51 }
 0x58e   :  { %v1151_v53 = vpop.f32.mrf.mxu1 }
 0x58f   :  { %v869_v54 = vmax.f32 %v864_v52, 0.0 }
 0x590   :  { %v866_v55 = vpop.f32.mrf.mxu1 }
 0x591   :  { %v870_v56 = vpack.c.bf16 %v869_v54, %v869_v54 }
 0x592   :  { %v1152_v57 = vpop.f32.mrf.mxu1 }
 0x593   :  { %1156 = vmatmul.mubr.msk.bf16.vlgmr.msra.gmra.mxu0 %vm883_vm7, %v870_v56 }
 0x653   :  { %v921_v59 = vpop.f32.mrf.mxu0 }
 0x654   :  { %v922_v60 = vadd.f32 %v991_v58, %v921_v59 }
 0x655   :  { %v1157_v61 = vpop.f32.mrf.mxu0 }
 0x656   :  { %v927_v62 = vadd.f32 %v922_v60, %v1483_v11 }
 0x657   :  { %v924_v63 = vpop.f32.mrf.mxu0 }
 0x658   :  { %928 = vst [vmem:[#allocation2] sm:$0xff] %v927_v62 }
 0x659   :  { %v1158_v0 = vpop.f32.mrf.mxu0 }
 0x65a   :  { %1207 = shalt.err (!%p1204_p4)
}
 0x65b   :  { %938 = dma.vmem_to_hbm [thread:$0]  %s936_s2, 128, %s1563_s21, [#allocation3]  }
 0x65c   :  { %1216 = dma.done.wait [#allocation3], 128  }
 0x65d   :  { %1217 = vsyncadd [#allocation3], 4294967168 }
 0x65e   :  { %942 = vsyncpa [#allocation3], 1 }

</bundles_post_ra>
